<compile_context>
chip_gen: v6e
topology: v6e:2x2x1
jax: 0.10.0
libtpu: 0.0.40
codegen_flags: <defaults>
</compile_context>

<pallas_src>
import functools

import jax
import jax.numpy as jnp
from jax import lax
from jax.experimental import pallas as pl
from jax.experimental.pallas import tpu as pltpu

LANE = 128
SUBLANE = 8
GATE_ORDER = (0, 1, 3, 2)   # PyTorch (i, f, g, o)  ->  kernel (i, f, o, g)


def lstm_classifier_kernel(gi_ref, whh_ref, wcls_ref, bcls_ref, out_ref,
                           h_ref, c_ref, *, hp, tc, seq_len, t_total):
    """One grid step == one (batch-block, time-chunk) of the LSTM recurrence.

    gi_ref already holds  x_t @ W_ih^T + b_ih + b_hh  (gates packed i,f,o,g,
    each padded to hp=H_pad lanes), so the serial path is just the hidden
    projection + gate math.  Padded hidden lanes stay exactly zero (zero gi,
    zero bias, zero W_hh rows -> i=f=o=0.5, g=0 -> c,h remain 0).
    """
    t_idx = pl.program_id(1)

    @pl.when(t_idx == 0)
    def _():
        h_ref[...] = jnp.zeros_like(h_ref)
        c_ref[...] = jnp.zeros_like(c_ref)

    whh = whh_ref[...]                          # (H_pad, 4*H_pad) bf16, resident

    def step(t, carry):
        h, c = carry
        gates = gi_ref[t].astype(jnp.float32) + jnp.dot(
            h.astype(jnp.bfloat16), whh, preferred_element_type=jnp.float32)
        sig = jax.nn.sigmoid(gates[:, :3 * hp])          # i | f | o  (one EUP slab)
        g = jnp.tanh(gates[:, 3 * hp:])                  # g
        i = sig[:, :hp]
        f = sig[:, hp:2 * hp]
        o = sig[:, 2 * hp:]
        c_new = f * c + i * g
        h_new = o * jnp.tanh(c_new)
        if t_total != seq_len:
            # padded timesteps: keep previous (h, c) via a scalar blend
            m = (t_idx * tc + t < seq_len).astype(jnp.float32)
            h_new = h + m * (h_new - h)
            c_new = c + m * (c_new - c)
        return h_new, c_new

    h, c = lax.fori_loop(0, tc, step, (h_ref[...], c_ref[...]),
                         unroll=min(tc, 8))
    h_ref[...] = h
    c_ref[...] = c

    # Classifier head on the final chunk; output slab is lane-dense (b_tile, 128).
    @pl.when(t_idx == pl.num_programs(1) - 1)
    def _():
        logits = jnp.dot(h, wcls_ref[...],
                         preferred_element_type=jnp.float32) + bcls_ref[...]
        out_ref[...] = jax.nn.sigmoid(logits)


@functools.partial(jax.jit, static_argnames=("t_chunk", "b_tile", "gi_dtype"))
def simple_classifier_forward(tokens, params, *, t_chunk=32, b_tile=None,
                              gi_dtype=jnp.float32):
    """tokens: (B, T) int32 -> (B,) float32 probabilities."""
    B, T = tokens.shape
    V, H = params["embedding"].shape
    H_pad, G_pad = params["w_hh_T"].shape           # (H_pad, 4*H_pad)

    # ---------------- non-recurrent phase (wrapper, time-major) ----------------
    tokens_tm = tokens.T                                              # (T, B)
    if V <= B * T:
        # fused table: one gather builds gi (bias folded in)
        table = jnp.dot(params["embedding"], params["w_ih_T"]) + params["bias"]
        gi = table[tokens_tm]                                         # (T, B, G_pad)
    else:
        x = params["embedding"][tokens_tm]                            # (T, B, H)
        gi = (jnp.dot(x.reshape(T * B, H), params["w_ih_T"])
              + params["bias"]).reshape(T, B, G_pad)
    gi = gi.astype(gi_dtype)

    # ---------------- padding: batch to sublane multiple, T to chunk multiple --
    B_pad = -(-B // SUBLANE) * SUBLANE
    tc = max(1, min(t_chunk, T))
    T_pad = -(-T // tc) * tc
    if (T_pad, B_pad) != (T, B):
        gi = jnp.pad(gi, ((0, T_pad - T), (0, B_pad - B), (0, 0)))

    if b_tile is None:
        bt = B_pad                      # single batch block (v5e/v6e: one TC)
    else:
        bt = max(SUBLANE, (int(b_tile) // SUBLANE) * SUBLANE)
        if B_pad % bt:
            bt = B_pad
    grid = (B_pad // bt, T_pad // tc)   # (parallel batch blocks, sequential time)

    # ---------------- VMEM budget (keep v7x's 64 MiB in mind) ------------------
    gi_bytes = jnp.dtype(gi_dtype).itemsize
    vmem_bytes = (2 * tc * bt * G_pad * gi_bytes        # gi (double-buffered)
                  + 2 * H_pad * G_pad * 2               # W_hh bf16
                  + 2 * H_pad * LANE * 4                # W_cls
                  + 2 * SUBLANE * LANE * 4              # b_cls
                  + 2 * bt * LANE * 4                   # out
                  + 2 * bt * H_pad * 4)                 # h, c scratch
    vmem_limit = int(min(100 * 2**20, max(32 * 2**20, vmem_bytes + (4 << 20))))

    kernel = functools.partial(lstm_classifier_kernel,
                               hp=H_pad, tc=tc, seq_len=T, t_total=T_pad)

    out = pl.pallas_call(
        kernel,
        out_shape=jax.ShapeDtypeStruct((B_pad, LANE), jnp.float32),
        grid_spec=pltpu.PrefetchScalarGridSpec(
            num_scalar_prefetch=0,
            grid=grid,
            in_specs=[
                pl.BlockSpec((tc, bt, G_pad), lambda b, t: (t, b, 0)),   # gi chunk
                pl.BlockSpec((H_pad, G_pad), lambda b, t: (0, 0)),       # W_hh^T bf16
                pl.BlockSpec((H_pad, LANE), lambda b, t: (0, 0)),        # W_cls^T pad
                pl.BlockSpec((1, LANE), lambda b, t: (0, 0)),            # b_cls pad
            ],
            out_specs=pl.BlockSpec((bt, LANE), lambda b, t: (b, 0)),
            scratch_shapes=[pltpu.VMEM((bt, H_pad), jnp.float32),        # h carry
                            pltpu.VMEM((bt, H_pad), jnp.float32)],       # c carry
        ),
        compiler_params=pltpu.CompilerParams(
            dimension_semantics=("parallel", "arbitrary"),  # batch || , time seq
            vmem_limit_bytes=vmem_limit),
    )(gi, params["w_hh_T"], params["w_cls_T"], params["b_cls"])

    return out[:B, 0]


def init_params(key, vocab_size, hidden_size):
    """Deterministic synthetic parameters in PyTorch layout (gates i,f,g,o)."""
    H = hidden_size
    k = 1.0 / jnp.sqrt(jnp.float32(H))
    keys = jax.random.split(key, 7)
    return {
        "embedding": jax.random.normal(keys[0], (vocab_size, H), jnp.float32),
        "w_ih": jax.random.uniform(keys[1], (4 * H, H), jnp.float32, -k, k),
        "w_hh": jax.random.uniform(keys[2], (4 * H, H), jnp.float32, -k, k),
        "b_ih": jax.random.uniform(keys[3], (4 * H,), jnp.float32, -k, k),
        "b_hh": jax.random.uniform(keys[4], (4 * H,), jnp.float32, -k, k),
        "w_cls": jax.random.uniform(keys[5], (1, H), jnp.float32, -k, k),
        "b_cls": jax.random.uniform(keys[6], (1,), jnp.float32, -k, k),
    }


def pack_params(tp):
    """PyTorch-layout params -> kernel layout: gates reordered to (i,f,o,g),
    hidden padded to a 128 multiple, W_hh in bf16, classifier lane-padded."""
    H = tp["embedding"].shape[1]
    H_pad = -(-H // LANE) * LANE
    G_pad = 4 * H_pad

    def pack_w(w):                       # (4H, H) torch rows -> (G_pad, H)
        out = jnp.zeros((G_pad, H), jnp.float32)
        for slot, g in enumerate(GATE_ORDER):
            out = out.at[slot * H_pad:slot * H_pad + H, :].set(
                w[g * H:(g + 1) * H, :])
        return out

    def pack_b(b):
        out = jnp.zeros((G_pad,), jnp.float32)
        for slot, g in enumerate(GATE_ORDER):
            out = out.at[slot * H_pad:slot * H_pad + H].set(b[g * H:(g + 1) * H])
        return out

    w_ih_T = pack_w(tp["w_ih"]).T                                  # (H, G_pad) f32
    w_hh_T = (jnp.zeros((H_pad, G_pad), jnp.float32)
              .at[:H, :].set(pack_w(tp["w_hh"]).T)
              .astype(jnp.bfloat16))                               # (H_pad, G_pad) bf16
    bias = (pack_b(tp["b_ih"]) + pack_b(tp["b_hh"])).reshape(1, G_pad)
    w_cls_T = jnp.zeros((H_pad, LANE), jnp.float32).at[:H, 0].set(tp["w_cls"][0])
    b_cls = jnp.zeros((1, LANE), jnp.float32).at[0, 0].set(tp["b_cls"][0])
    return {"embedding": tp["embedding"], "w_ih_T": w_ih_T, "w_hh_T": w_hh_T,
            "bias": bias, "w_cls_T": w_cls_T, "b_cls": b_cls}


def reference_forward(tokens, tp):
    """Pure-JAX f32 reference of the PyTorch forward (LSTM, gates i,f,g,o)."""
    H = tp["embedding"].shape[1]
    emb = tp["embedding"][tokens]                                  # (B, T, H)
    B = emb.shape[0]
    w_ih_T, w_hh_T = tp["w_ih"].T, tp["w_hh"].T
    bias = (tp["b_ih"] + tp["b_hh"]).reshape(1, -1)

    def step(carry, x_t):
        h, c = carry
        gates = x_t @ w_ih_T + h @ w_hh_T + bias
        i = jax.nn.sigmoid(gates[:, 0:H])
        f = jax.nn.sigmoid(gates[:, H:2 * H])
        g = jnp.tanh(gates[:, 2 * H:3 * H])
        o = jax.nn.sigmoid(gates[:, 3 * H:4 * H])
        c_new = f * c + i * g
        h_new = o * jnp.tanh(c_new)
        return (h_new, c_new), None

    h0 = jnp.zeros((B, H), jnp.float32)
    c0 = jnp.zeros((B, H), jnp.float32)
    (h_last, _), _ = lax.scan(step, (h0, c0), jnp.transpose(emb, (1, 0, 2)))
    logits = h_last @ tp["w_cls"].T + tp["b_cls"]
    return jax.nn.sigmoid(logits)[:, 0]


if __name__ == "__main__":
    B, T, H, VOCAB = 2, 8, 32, 16
    key = jax.random.PRNGKey(0)
    k_param, k_tok = jax.random.split(key)

    torch_params = init_params(k_param, VOCAB, H)
    params = pack_params(torch_params)
    tokens = jax.random.randint(k_tok, (B, T), 0, VOCAB, dtype=jnp.int32)

    ref = reference_forward(tokens, torch_params)

    # t_chunk=3 -> 3 time-chunks with one padded (masked) step: exercises the
    # unrolled in-kernel loop, the h/c carry across sequential grid steps, the
    # T-padding mask and the pl.when classifier epilogue.
    probs = jax.block_until_ready(
        simple_classifier_forward(tokens, params, t_chunk=3))
    assert probs.shape == (B,)
    # bf16 W_hh on the serial path -> compare against the f32 reference with a
    # slightly loosened tolerance.
    assert jnp.allclose(probs, ref, atol=1e-2, rtol=0.0), (probs, ref)

    # Default chunking (single chunk, no masking) must also run and agree.
    probs2 = jax.block_until_ready(simple_classifier_forward(tokens, params))
    assert jnp.allclose(probs2, ref, atol=1e-2, rtol=0.0), (probs2, ref)

    print("KERNEL_OK")
</pallas_src>

<mosaic_0001>
module attributes {stable_mosaic.version = 11 : i64} {
  func.func @lstm_classifier_kernel(%arg0: i32, %arg1: i32, %arg2: memref<3x8x512xf32, #tpu.memory_space<vmem>>, %arg3: memref<128x512xbf16, #tpu.memory_space<vmem>>, %arg4: memref<128x128xf32, #tpu.memory_space<vmem>>, %arg5: memref<1x128xf32, #tpu.memory_space<vmem>>, %arg6: memref<8x128xf32, #tpu.memory_space<vmem>>, %arg7: memref<8x128xf32, #tpu.memory_space<vmem>>, %arg8: memref<8x128xf32, #tpu.memory_space<vmem>>) attributes {dimension_semantics = [#tpu.dimension_semantics<parallel>, #tpu.dimension_semantics<arbitrary>], iteration_bounds = array<i64: 1, 3>, scalar_prefetch = 0 : i64, scratch_operands = 2 : i64, tpu.core_type = #tpu.core_type<tc>, window_params = [{transform_indices = @transform_0, window_bounds = array<i64: 3, 8, 512>}, {pipeline_mode = #tpu.pipeline_mode<synchronous>, transform_indices = @transform_1, window_bounds = array<i64: 128, 512>}, {pipeline_mode = #tpu.pipeline_mode<synchronous>, transform_indices = @transform_2, window_bounds = array<i64: 128, 128>}, {pipeline_mode = #tpu.pipeline_mode<synchronous>, transform_indices = @transform_3, window_bounds = array<i64: 1, 128>}, {transform_indices = @transform_4, window_bounds = array<i64: 8, 128>}]} {
    %c0_i32 = arith.constant 0 : i32
    %0 = arith.cmpi eq, %arg1, %c0_i32 : i32
    %1 = arith.extui %0 : i1 to i32
    %c0_i32_0 = arith.constant 0 : i32
    %2 = arith.cmpi ne, %1, %c0_i32_0 : i32
    scf.if %2 {
      %cst_29 = arith.constant 0.000000e+00 : f32
      %116 = vector.broadcast %cst_29 : f32 to vector<8x128xf32>
      %c0_30 = arith.constant 0 : index
      %c0_31 = arith.constant 0 : index
      %117 = vector.load %arg7[%c0_30, %c0_31] : memref<8x128xf32, #tpu.memory_space<vmem>>, vector<8x128xf32>
      tpu.vector_store %arg7[%c0_30, %c0_31], %116 {strides = array<i32>} : memref<8x128xf32, #tpu.memory_space<vmem>>, vector<8x128xf32>,
      %cst_32 = arith.constant 0.000000e+00 : f32
      %118 = vector.broadcast %cst_32 : f32 to vector<8x128xf32>
      %c0_33 = arith.constant 0 : index
      %c0_34 = arith.constant 0 : index
      %119 = vector.load %arg8[%c0_33, %c0_34] : memref<8x128xf32, #tpu.memory_space<vmem>>, vector<8x128xf32>
      tpu.vector_store %arg8[%c0_33, %c0_34], %118 {strides = array<i32>} : memref<8x128xf32, #tpu.memory_space<vmem>>, vector<8x128xf32>,
    } else {
    }
    %c0 = arith.constant 0 : index
    %c0_1 = arith.constant 0 : index
    %3 = vector.load %arg3[%c0, %c0_1] : memref<128x512xbf16, #tpu.memory_space<vmem>>, vector<128x512xbf16>
    %c0_2 = arith.constant 0 : index
    %c0_3 = arith.constant 0 : index
    %4 = vector.load %arg7[%c0_2, %c0_3] : memref<8x128xf32, #tpu.memory_space<vmem>>, vector<8x128xf32>
    %c0_4 = arith.constant 0 : index
    %c0_5 = arith.constant 0 : index
    %5 = vector.load %arg8[%c0_4, %c0_5] : memref<8x128xf32, #tpu.memory_space<vmem>>, vector<8x128xf32>
    %c0_i32_6 = arith.constant 0 : i32
    %6 = arith.index_cast %c0_i32_6 : i32 to index
    %c0_7 = arith.constant 0 : index
    %c0_8 = arith.constant 0 : index
    %7 = vector.load %arg2[%6, %c0_7, %c0_8] : memref<3x8x512xf32, #tpu.memory_space<vmem>>, vector<1x8x512xf32>
    %8 = vector.shape_cast %7 : vector<1x8x512xf32> to vector<8x512xf32>
    %9 = arith.truncf %4 : vector<8x128xf32> to vector<8x128xbf16>
    %cst = arith.constant dense<0.000000e+00> : vector<8x512xf32>
    %10 = tpu.matmul %9, %3, %cst {dimension_numbers = #tpu.dot_dimension_numbers<[1], [0], [0], [1], [0, 0, 1, 1], [], []>} : vector<8x128xbf16>, vector<128x512xbf16>, vector<8x512xf32> -> vector<8x512xf32>
    %11 = arith.addf %8, %10 : vector<8x512xf32>
    %12 = vector.extract_strided_slice %11 {offsets = [0, 0], sizes = [8, 384], strides = [1, 1]} : vector<8x512xf32> to vector<8x384xf32>
    %13 = arith.negf %12 : vector<8x384xf32>
    %14 = math.exp %13 : vector<8x384xf32>
    %cst_9 = arith.constant 1.000000e+00 : f32
    %15 = vector.broadcast %cst_9 : f32 to vector<8x384xf32>
    %16 = arith.addf %15, %14 : vector<8x384xf32>
    %17 = arith.divf %15, %16 : vector<8x384xf32>
    %18 = vector.extract_strided_slice %11 {offsets = [0, 384], sizes = [8, 128], strides = [1, 1]} : vector<8x512xf32> to vector<8x128xf32>
    %19 = math.tanh %18 : vector<8x128xf32>
    %20 = vector.extract_strided_slice %17 {offsets = [0, 0], sizes = [8, 128], strides = [1, 1]} : vector<8x384xf32> to vector<8x128xf32>
    %21 = vector.extract_strided_slice %17 {offsets = [0, 128], sizes = [8, 128], strides = [1, 1]} : vector<8x384xf32> to vector<8x128xf32>
    %22 = vector.extract_strided_slice %17 {offsets = [0, 256], sizes = [8, 128], strides = [1, 1]} : vector<8x384xf32> to vector<8x128xf32>
    %23 = arith.mulf %21, %5 : vector<8x128xf32>
    %24 = arith.mulf %20, %19 : vector<8x128xf32>
    %25 = arith.addf %23, %24 : vector<8x128xf32>
    %26 = math.tanh %25 : vector<8x128xf32>
    %27 = arith.mulf %22, %26 : vector<8x128xf32>
    %c3_i32 = arith.constant 3 : i32
    %28 = arith.muli %arg1, %c3_i32 : i32
    %29 = arith.addi %28, %c0_i32_6 : i32
    %c8_i32 = arith.constant 8 : i32
    %30 = arith.cmpi slt, %29, %c8_i32 : i32
    %31 = arith.extui %30 : i1 to i32
    %32 = arith.sitofp %31 : i32 to f32
    %33 = arith.subf %27, %4 : vector<8x128xf32>
    %34 = vector.broadcast %32 : f32 to vector<8x128xf32>
    %35 = arith.mulf %34, %33 : vector<8x128xf32>
    %36 = arith.addf %4, %35 : vector<8x128xf32>
    %37 = arith.subf %25, %5 : vector<8x128xf32>
    %38 = vector.broadcast %32 : f32 to vector<8x128xf32>
    %39 = arith.mulf %38, %37 : vector<8x128xf32>
    %40 = arith.addf %5, %39 : vector<8x128xf32>
    %c1_i32 = arith.constant 1 : i32
    %41 = arith.index_cast %c1_i32 : i32 to index
    %c0_10 = arith.constant 0 : index
    %c0_11 = arith.constant 0 : index
    %42 = vector.load %arg2[%41, %c0_10, %c0_11] : memref<3x8x512xf32, #tpu.memory_space<vmem>>, vector<1x8x512xf32>
    %43 = vector.shape_cast %42 : vector<1x8x512xf32> to vector<8x512xf32>
    %44 = arith.truncf %36 : vector<8x128xf32> to vector<8x128xbf16>
    %cst_12 = arith.constant dense<0.000000e+00> : vector<8x512xf32>
    %45 = tpu.matmul %44, %3, %cst_12 {dimension_numbers = #tpu.dot_dimension_numbers<[1], [0], [0], [1], [0, 0, 1, 1], [], []>} : vector<8x128xbf16>, vector<128x512xbf16>, vector<8x512xf32> -> vector<8x512xf32>
    %46 = arith.addf %43, %45 : vector<8x512xf32>
    %47 = vector.extract_strided_slice %46 {offsets = [0, 0], sizes = [8, 384], strides = [1, 1]} : vector<8x512xf32> to vector<8x384xf32>
    %48 = arith.negf %47 : vector<8x384xf32>
    %49 = math.exp %48 : vector<8x384xf32>
    %cst_13 = arith.constant 1.000000e+00 : f32
    %50 = vector.broadcast %cst_13 : f32 to vector<8x384xf32>
    %51 = arith.addf %50, %49 : vector<8x384xf32>
    %52 = arith.divf %50, %51 : vector<8x384xf32>
    %53 = vector.extract_strided_slice %46 {offsets = [0, 384], sizes = [8, 128], strides = [1, 1]} : vector<8x512xf32> to vector<8x128xf32>
    %54 = math.tanh %53 : vector<8x128xf32>
    %55 = vector.extract_strided_slice %52 {offsets = [0, 0], sizes = [8, 128], strides = [1, 1]} : vector<8x384xf32> to vector<8x128xf32>
    %56 = vector.extract_strided_slice %52 {offsets = [0, 128], sizes = [8, 128], strides = [1, 1]} : vector<8x384xf32> to vector<8x128xf32>
    %57 = vector.extract_strided_slice %52 {offsets = [0, 256], sizes = [8, 128], strides = [1, 1]} : vector<8x384xf32> to vector<8x128xf32>
    %58 = arith.mulf %56, %40 : vector<8x128xf32>
    %59 = arith.mulf %55, %54 : vector<8x128xf32>
    %60 = arith.addf %58, %59 : vector<8x128xf32>
    %61 = math.tanh %60 : vector<8x128xf32>
    %62 = arith.mulf %57, %61 : vector<8x128xf32>
    %c3_i32_14 = arith.constant 3 : i32
    %63 = arith.muli %arg1, %c3_i32_14 : i32
    %64 = arith.addi %63, %c1_i32 : i32
    %c8_i32_15 = arith.constant 8 : i32
    %65 = arith.cmpi slt, %64, %c8_i32_15 : i32
    %66 = arith.extui %65 : i1 to i32
    %67 = arith.sitofp %66 : i32 to f32
    %68 = arith.subf %62, %36 : vector<8x128xf32>
    %69 = vector.broadcast %67 : f32 to vector<8x128xf32>
    %70 = arith.mulf %69, %68 : vector<8x128xf32>
    %71 = arith.addf %36, %70 : vector<8x128xf32>
    %72 = arith.subf %60, %40 : vector<8x128xf32>
    %73 = vector.broadcast %67 : f32 to vector<8x128xf32>
    %74 = arith.mulf %73, %72 : vector<8x128xf32>
    %75 = arith.addf %40, %74 : vector<8x128xf32>
    %c2_i32 = arith.constant 2 : i32
    %76 = arith.index_cast %c2_i32 : i32 to index
    %c0_16 = arith.constant 0 : index
    %c0_17 = arith.constant 0 : index
    %77 = vector.load %arg2[%76, %c0_16, %c0_17] : memref<3x8x512xf32, #tpu.memory_space<vmem>>, vector<1x8x512xf32>
    %78 = vector.shape_cast %77 : vector<1x8x512xf32> to vector<8x512xf32>
    %79 = arith.truncf %71 : vector<8x128xf32> to vector<8x128xbf16>
    %cst_18 = arith.constant dense<0.000000e+00> : vector<8x512xf32>
    %80 = tpu.matmul %79, %3, %cst_18 {dimension_numbers = #tpu.dot_dimension_numbers<[1], [0], [0], [1], [0, 0, 1, 1], [], []>} : vector<8x128xbf16>, vector<128x512xbf16>, vector<8x512xf32> -> vector<8x512xf32>
    %81 = arith.addf %78, %80 : vector<8x512xf32>
    %82 = vector.extract_strided_slice %81 {offsets = [0, 0], sizes = [8, 384], strides = [1, 1]} : vector<8x512xf32> to vector<8x384xf32>
    %83 = arith.negf %82 : vector<8x384xf32>
    %84 = math.exp %83 : vector<8x384xf32>
    %cst_19 = arith.constant 1.000000e+00 : f32
    %85 = vector.broadcast %cst_19 : f32 to vector<8x384xf32>
    %86 = arith.addf %85, %84 : vector<8x384xf32>
    %87 = arith.divf %85, %86 : vector<8x384xf32>
    %88 = vector.extract_strided_slice %81 {offsets = [0, 384], sizes = [8, 128], strides = [1, 1]} : vector<8x512xf32> to vector<8x128xf32>
    %89 = math.tanh %88 : vector<8x128xf32>
    %90 = vector.extract_strided_slice %87 {offsets = [0, 0], sizes = [8, 128], strides = [1, 1]} : vector<8x384xf32> to vector<8x128xf32>
    %91 = vector.extract_strided_slice %87 {offsets = [0, 128], sizes = [8, 128], strides = [1, 1]} : vector<8x384xf32> to vector<8x128xf32>
    %92 = vector.extract_strided_slice %87 {offsets = [0, 256], sizes = [8, 128], strides = [1, 1]} : vector<8x384xf32> to vector<8x128xf32>
    %93 = arith.mulf %91, %75 : vector<8x128xf32>
    %94 = arith.mulf %90, %89 : vector<8x128xf32>
    %95 = arith.addf %93, %94 : vector<8x128xf32>
    %96 = math.tanh %95 : vector<8x128xf32>
    %97 = arith.mulf %92, %96 : vector<8x128xf32>
    %c3_i32_20 = arith.constant 3 : i32
    %98 = arith.muli %arg1, %c3_i32_20 : i32
    %99 = arith.addi %98, %c2_i32 : i32
    %c8_i32_21 = arith.constant 8 : i32
    %100 = arith.cmpi slt, %99, %c8_i32_21 : i32
    %101 = arith.extui %100 : i1 to i32
    %102 = arith.sitofp %101 : i32 to f32
    %103 = arith.subf %97, %71 : vector<8x128xf32>
    %104 = vector.broadcast %102 : f32 to vector<8x128xf32>
    %105 = arith.mulf %104, %103 : vector<8x128xf32>
    %106 = arith.addf %71, %105 : vector<8x128xf32>
    %107 = arith.subf %95, %75 : vector<8x128xf32>
    %108 = vector.broadcast %102 : f32 to vector<8x128xf32>
    %109 = arith.mulf %108, %107 : vector<8x128xf32>
    %110 = arith.addf %75, %109 : vector<8x128xf32>
    %c3_i32_22 = arith.constant 3 : i32
    %c0_23 = arith.constant 0 : index
    %c0_24 = arith.constant 0 : index
    %111 = vector.load %arg7[%c0_23, %c0_24] : memref<8x128xf32, #tpu.memory_space<vmem>>, vector<8x128xf32>
    tpu.vector_store %arg7[%c0_23, %c0_24], %106 {strides = array<i32>} : memref<8x128xf32, #tpu.memory_space<vmem>>, vector<8x128xf32>,
    %c0_25 = arith.constant 0 : index
    %c0_26 = arith.constant 0 : index
    %112 = vector.load %arg8[%c0_25, %c0_26] : memref<8x128xf32, #tpu.memory_space<vmem>>, vector<8x128xf32>
    tpu.vector_store %arg8[%c0_25, %c0_26], %110 {strides = array<i32>} : memref<8x128xf32, #tpu.memory_space<vmem>>, vector<8x128xf32>,
    %c2_i32_27 = arith.constant 2 : i32
    %113 = arith.cmpi eq, %arg1, %c2_i32_27 : i32
    %114 = arith.extui %113 : i1 to i32
    %c0_i32_28 = arith.constant 0 : i32
    %115 = arith.cmpi ne, %114, %c0_i32_28 : i32
    scf.if %115 {
      %c0_29 = arith.constant 0 : index
      %c0_30 = arith.constant 0 : index
      %116 = vector.load %arg4[%c0_29, %c0_30] : memref<128x128xf32, #tpu.memory_space<vmem>>, vector<128x128xf32>
      %cst_31 = arith.constant dense<0.000000e+00> : vector<8x128xf32>
      %117 = tpu.matmul %106, %116, %cst_31 {dimension_numbers = #tpu.dot_dimension_numbers<[1], [0], [0], [1], [0, 0, 1, 1], [], []>} : vector<8x128xf32>, vector<128x128xf32>, vector<8x128xf32> -> vector<8x128xf32>
      %c0_32 = arith.constant 0 : index
      %c0_33 = arith.constant 0 : index
      %118 = vector.load %arg5[%c0_32, %c0_33] : memref<1x128xf32, #tpu.memory_space<vmem>>, vector<1x128xf32>
      %119 = vector.broadcast %118 : vector<1x128xf32> to vector<8x128xf32>
      %120 = arith.addf %117, %119 : vector<8x128xf32>
      %121 = arith.negf %120 : vector<8x128xf32>
      %122 = math.exp %121 : vector<8x128xf32>
      %cst_34 = arith.constant 1.000000e+00 : f32
      %123 = vector.broadcast %cst_34 : f32 to vector<8x128xf32>
      %124 = arith.addf %123, %122 : vector<8x128xf32>
      %125 = arith.divf %123, %124 : vector<8x128xf32>
      %c0_35 = arith.constant 0 : index
      %c0_36 = arith.constant 0 : index
      %126 = vector.load %arg6[%c0_35, %c0_36] : memref<8x128xf32, #tpu.memory_space<vmem>>, vector<8x128xf32>
      tpu.vector_store %arg6[%c0_35, %c0_36], %125 {strides = array<i32>} : memref<8x128xf32, #tpu.memory_space<vmem>>, vector<8x128xf32>,
    } else {
    }
    return
  }
  func.func @transform_0(%arg0: i32, %arg1: i32) -> (i32, i32, i32) {
    %c0_i32 = arith.constant 0 : i32
    %c0_i32_0 = arith.constant 0 : i32
    return %arg1, %arg0, %c0_i32 : i32, i32, i32
  }
  func.func @transform_1(%arg0: i32, %arg1: i32) -> (i32, i32) {
    %c0_i32 = arith.constant 0 : i32
    %c0_i32_0 = arith.constant 0 : i32
    %c0_i32_1 = arith.constant 0 : i32
    return %c0_i32, %c0_i32_0 : i32, i32
  }
  func.func @transform_2(%arg0: i32, %arg1: i32) -> (i32, i32) {
    %c0_i32 = arith.constant 0 : i32
    %c0_i32_0 = arith.constant 0 : i32
    %c0_i32_1 = arith.constant 0 : i32
    return %c0_i32, %c0_i32_0 : i32, i32
  }
  func.func @transform_3(%arg0: i32, %arg1: i32) -> (i32, i32) {
    %c0_i32 = arith.constant 0 : i32
    %c0_i32_0 = arith.constant 0 : i32
    %c0_i32_1 = arith.constant 0 : i32
    return %c0_i32, %c0_i32_0 : i32, i32
  }
  func.func @transform_4(%arg0: i32, %arg1: i32) -> (i32, i32) {
    %c0_i32 = arith.constant 0 : i32
    %c0_i32_0 = arith.constant 0 : i32
    return %arg0, %c0_i32 : i32, i32
  }
}

</mosaic_0001>

<bundles_post_ra>
// kernel: simple_classifier_forward.1
= control target key start
LH: loop header
LB: loop body
LE: loop exit
PB: predicated region body
PF: predicated region fallthrough
CT: control target
= control target key end

     0   :  { %s1278_s15 = smov 0   ;;  %s1280_s16 = smov 0   ;;  %s1673_s0 = inlined_call_operand.vmem [shape: f32[9,8,512], index: 0, kind: input, shape index: {}]   ;;  %s1674_s1 = inlined_call_operand.vmem [shape: bf16[128,512], index: 1, kind: input, shape index: {}]   ;;  %s1675_s2 = inlined_call_operand.vmem [shape: f32[128,128], index: 2, kind: input, shape index: {}]   ;;  %s1676_s3 = inlined_call_operand.vmem [shape: f32[1,128], index: 3, kind: input, shape index: {}]   ;;  %s1677_s4 = inlined_call_operand.vmem [shape: f32[8,128], index: 4, kind: output, shape index: {}]  }
   0x1   :  { %s1282_s17 = smov 0  }
   0x2 LB: > { %s23_s18 = sadd.s32 1, %s1243_s16  ;;  %p985_p0 = scmp.ge.s32.totalorder %s1247_s17, 1  ;;  %s1247_s17 = sphi %s1282_s17, %s14_s17   ;;  %s1243_s16 = sphi %s1280_s16, %s1679_s16   ;;  %s1239_s15 = sphi %s1278_s15, %s1678_s15  }
   0x3   : > { %p24_p1 = scmp.ge.s32.totalorder %s23_s18, 3  ;;  %p182_p2 = scmp.lt.s32.totalorder %s1247_s17, 4 }
   0x5   : > { %s1681_s18 = smov (%p24_p1, %s23_s18), 0  ;;  %p183_p3 = pnand %p985_p0, %p182_p2 }
   0x6   : > { %s1299_s19 = smul.u32 (!%p183_p3), 3, %s1239_s15  ;;  %p988_p5 = scmp.ne.s32.totalorder (!%p183_p3), %s1239_s15, 0 }
   0x7   : > { %186 = sbr.rel (%p183_p3) target bundleno = 1085 (0x43d), region = 36 }
   0x8   : > { %p213_p4 = scmp.lt.s32.totalorder (!%p183_p3), %s1299_s19, 8 }
   0xc   : > { %s214_s20 = scalar_select %p213_p4, %s1299_s19, 8 }
   0xd   : > { %231 = sbr.rel (%p988_p5) target bundleno = 20 (0x14), region = 40 }
   0xe   : > { %s1044_s21 = sshll.u32 %s214_s20, 5 }
   0xf   : > { %s1308_s24 = scalar_lea.vmem %s1673_s0, %s1044_s21 }
  0x12   : > { %v1249_v0 = vmov 0.0  }
  0x13   : > { %232 = vst [vmem:[#allocation2] sm:$0xff] %v1249_v0  ;;  %233 = vst [vmem:[#allocation3] sm:$0xff] %v1249_v0 }
  0x14 PF: > { %v1314_v1 = vld [vmem:[%s1674_s1 + $0xe4] ss:$16 sps:$4 sm:$0xff]   ;;  %v1319_v2 = vld [vmem:[%s1674_s1 + $0xe0] ss:$16 sps:$4 sm:$0xff]   ;;  %v1250_v3 = vmov 0   ;;  %v269_v38 = vld [vmem:[%s1308_s24 + $0x8] sm:$0xff] }
  0x15   : > { %465 = vmatprep.mubr.bf16.mxu0 %v1250_v3  ;;  %506 = vmatprep.mubr.bf16.mxu1 %v1250_v3  ;;  %v1327_v4 = vld [vmem:[%s1674_s1 + $0xc4] ss:$16 sps:$4 sm:$0xff]   ;;  %v1333_v5 = vld [vmem:[%s1674_s1 + $0xc0] ss:$16 sps:$4 sm:$0xff]   ;;  %v1344_v7 = vld [vmem:[%s1674_s1 + $0xec] ss:$16 sps:$4 sm:$0xff]  }
  0x16   : > { %433 = vmatprep.subr.bf16.mxu0 %v1314_v1  ;;  %v1339_v6 = vld [vmem:[%s1674_s1 + $0xa4] ss:$16 sps:$4 sm:$0xff]   ;;  %v1349_v8 = vld [vmem:[%s1674_s1 + $0xe8] ss:$16 sps:$4 sm:$0xff]   ;;  %v1355_v9 = vld [vmem:[%s1674_s1 + $0xa0] ss:$16 sps:$4 sm:$0xff]   ;;  %474 = vmatprep.subr.bf16.mxu1 %v1344_v7 }
  0x17   : > { %434 = vmatpush1.bf16.msra.mxu0 %v1319_v2  ;;  %v1362_v10 = vld [vmem:[%s1674_s1 + $0x84] ss:$16 sps:$4 sm:$0xff]   ;;  %475 = vmatpush1.bf16.msra.mxu1 %v1349_v8  ;;  %v1368_v11 = vld [vmem:[%s1674_s1 + $0xcc] ss:$16 sps:$4 sm:$0xff]   ;;  %v1373_v12 = vld [vmem:[%s1674_s1 + $0xc8] ss:$16 sps:$4 sm:$0xff]  }
  0x18   : > { %435 = vmatprep.subr.bf16.mxu0 %v1327_v4  ;;  %476 = vmatprep.subr.bf16.mxu1 %v1368_v11  ;;  %v1380_v13 = vld [vmem:[%s1674_s1 + $0x80] ss:$16 sps:$4 sm:$0xff]   ;;  %v1385_v14 = vld [vmem:[%s1674_s1 + $0x64] ss:$16 sps:$4 sm:$0xff]   ;;  %v1390_v15 = vld [vmem:[%s1674_s1 + $0xac] ss:$16 sps:$4 sm:$0xff]  }
  0x19   : > { %v1397_v16 = vld [vmem:[%s1674_s1 + $0xa8] ss:$16 sps:$4 sm:$0xff]   ;;  %v1403_v17 = vld [vmem:[%s1674_s1 + $0x8c] ss:$16 sps:$4 sm:$0xff]   ;;  %v1409_v18 = vld [vmem:[%s1674_s1 + $0x60] ss:$16 sps:$4 sm:$0xff]  }
  0x1a   : > { %v1415_v19 = vld [vmem:[%s1674_s1 + $0x44] ss:$16 sps:$4 sm:$0xff]   ;;  %v1421_v20 = vld [vmem:[%s1674_s1 + $0x88] ss:$16 sps:$4 sm:$0xff]   ;;  %v1427_v21 = vld [vmem:[%s1674_s1 + $0x6c] ss:$16 sps:$4 sm:$0xff]  }
  0x1b   : > { %436 = vmatpush1.bf16.msra.mxu0 %v1333_v5  ;;  %477 = vmatpush1.bf16.msra.mxu1 %v1373_v12  ;;  %v1432_v22 = vld [vmem:[%s1674_s1 + $0x40] ss:$16 sps:$4 sm:$0xff]   ;;  %v1438_v23 = vld [vmem:[%s1674_s1 + $0x24] ss:$16 sps:$4 sm:$0xff]   ;;  %v1445_v24 = vld [vmem:[%s1674_s1 + $0x68] ss:$16 sps:$4 sm:$0xff]  }
  0x1c   : > { %437 = vmatprep.subr.bf16.mxu0 %v1339_v6  ;;  %478 = vmatprep.subr.bf16.mxu1 %v1390_v15  ;;  %v1451_v25 = vld [vmem:[%s1674_s1 + $0x4c] ss:$16 sps:$4 sm:$0xff]   ;;  %v1457_v26 = vld [vmem:[%s1674_s1 + $0x20] ss:$16 sps:$4 sm:$0xff]   ;;  %v1463_v27 = vld [vmem:[%s1674_s1 + $0x4] ss:$16 sps:$4 sm:$0xff]  }
  0x1d   : > { %v1469_v28 = vld [vmem:[%s1674_s1 + $0x48] ss:$16 sps:$4 sm:$0xff]   ;;  %v1475_v29 = vld [vmem:[%s1674_s1 + $0x2c] ss:$16 sps:$4 sm:$0xff]   ;;  %v1481_v30 = vld [vmem:[%s1674_s1] ss:$16 sps:$4 sm:$0xff]  }
  0x1e   : > { %v1483_v31 = vld [vmem:[#allocation2] sm:$0xff]  ;;  %v1490_v32 = vld [vmem:[%s1674_s1 + $0x28] ss:$16 sps:$4 sm:$0xff]   ;;  %v1496_v33 = vld [vmem:[%s1674_s1 + $0xc] ss:$16 sps:$4 sm:$0xff]   ;;  %s670_s5 = sadd.s32 1, %s1299_s19 }
  0x1f   : > { %438 = vmatpush1.bf16.msra.mxu0 %v1355_v9  ;;  %479 = vmatpush1.bf16.msra.mxu1 %v1397_v16  ;;  %v272_v34 = vpack.c.bf16 %v1483_v31, %v1483_v31  ;;  %v1505_v35 = vld [vmem:[%s1674_s1 + $0x8] ss:$16 sps:$4 sm:$0xff]   ;;  %v268_v36 = vld [vmem:[%s1308_s24] sm:$0xff]  ;;  %v270_v48 = vld [vmem:[%s1308_s24 + $0x10] sm:$0xff]  ;;  %s545_s29 = scalar_select %p213_p4, 1, 0 }
  0x20   : > { %439 = vmatprep.subr.bf16.mxu0 %v1362_v10  ;;  %480 = vmatprep.subr.bf16.mxu1 %v1403_v17  ;;  %v271_v52 = vld [vmem:[%s1308_s24 + $0x18] sm:$0xff]  ;;  %v1551_v62 = vld [vmem:[#allocation3] sm:$0xff]  ;;  %p671_p6 = scmp.lt.s32.totalorder %s670_s5, 8  ;;  %s797_s8 = sadd.s32 2, %s1299_s19 }
  0x21   : > { %s546_s30 = scvt.s32.f32 %s545_s29  ;;  %p798_p7 = scmp.lt.s32.totalorder %s797_s8, 8 }
  0x22   : > { %s672_s6 = scalar_select %p671_p6, 1, 0 }
  0x23   : > { %440 = vmatpush1.bf16.msra.mxu0 %v1380_v13  ;;  %481 = vmatpush1.bf16.msra.mxu1 %v1421_v20  ;;  %s799_s9 = scalar_select %p798_p7, 1, 0 }
  0x24   : > { %441 = vmatprep.subr.bf16.mxu0 %v1385_v14  ;;  %482 = vmatprep.subr.bf16.mxu1 %v1427_v21  ;;  %s673_s7 = scvt.s32.f32 %s672_s6  ;;  %p1038_p8 = scmp.ne.s32.totalorder %s1239_s15, 2 }
  0x25   : > { %s800_s10 = scvt.s32.f32 %s799_s9 }
  0x27   : > { %442 = vmatpush1.bf16.msra.mxu0 %v1409_v18  ;;  %483 = vmatpush1.bf16.msra.mxu1 %v1445_v24 }
  0x28   : > { %443 = vmatprep.subr.bf16.mxu0 %v1415_v19  ;;  %484 = vmatprep.subr.bf16.mxu1 %v1451_v25 }
  0x2b   : > { %444 = vmatpush1.bf16.msra.mxu0 %v1432_v22  ;;  %485 = vmatpush1.bf16.msra.mxu1 %v1469_v28 }
  0x2c   : > { %445 = vmatprep.subr.bf16.mxu0 %v1438_v23  ;;  %486 = vmatprep.subr.bf16.mxu1 %v1475_v29 }
  0x2f   : > { %446 = vmatpush1.bf16.msra.mxu0 %v1457_v26  ;;  %487 = vmatpush1.bf16.msra.mxu1 %v1490_v32 }
  0x30   : > { %447 = vmatprep.subr.bf16.mxu0 %v1463_v27  ;;  %488 = vmatprep.subr.bf16.mxu1 %v1496_v33 }
  0x33   : > { %448 = vmatpush1.bf16.msra.mxu0 %v1481_v30  ;;  %489 = vmatpush1.bf16.msra.mxu1 %v1505_v35 }
  0x34   : > { %560 = vmatprep.subr.bf16.mxu0 %v1314_v1  ;;  %601 = vmatprep.subr.bf16.mxu1 %v1344_v7 }
  0x36   : > { %466 = vmatmul.mubr.bf16.vlgmr.msra.gmra.mxu0 %v272_v34  ;;  %507 = vmatmul.mubr.bf16.vlgmr.msra.gmra.mxu1 %v272_v34 }
  0x37   : > { %561 = vmatpush1.bf16.msra.mxu0 %v1319_v2  ;;  %592 = vmatprep.mubr.bf16.mxu0 %v1250_v3 }
  0x38   : > { %562 = vmatprep.subr.bf16.mxu0 %v1327_v4  ;;  %602 = vmatpush1.bf16.msra.mxu1 %v1349_v8 }
  0x39   : > { %603 = vmatprep.subr.bf16.mxu1 %v1368_v11  ;;  %633 = vmatprep.mubr.bf16.mxu1 %v1250_v3 }
  0x3b   : > { %563 = vmatpush1.bf16.msra.mxu0 %v1333_v5 }
  0x3c   : > { %564 = vmatprep.subr.bf16.mxu0 %v1339_v6  ;;  %604 = vmatpush1.bf16.msra.mxu1 %v1373_v12 }
  0x3d   : > { %605 = vmatprep.subr.bf16.mxu1 %v1390_v15 }
  0x3f   : > { %565 = vmatpush1.bf16.msra.mxu0 %v1355_v9 }
  0x40   : > { %566 = vmatprep.subr.bf16.mxu0 %v1362_v10  ;;  %606 = vmatpush1.bf16.msra.mxu1 %v1397_v16 }
  0x41   : > { %607 = vmatprep.subr.bf16.mxu1 %v1403_v17 }
  0x43   : > { %567 = vmatpush1.bf16.msra.mxu0 %v1380_v13 }
  0x44   : > { %568 = vmatprep.subr.bf16.mxu0 %v1385_v14  ;;  %608 = vmatpush1.bf16.msra.mxu1 %v1421_v20 }
  0x45   : > { %609 = vmatprep.subr.bf16.mxu1 %v1427_v21 }
  0x47   : > { %569 = vmatpush1.bf16.msra.mxu0 %v1409_v18 }
  0x48   : > { %570 = vmatprep.subr.bf16.mxu0 %v1415_v19  ;;  %610 = vmatpush1.bf16.msra.mxu1 %v1445_v24 }
  0x49   : > { %611 = vmatprep.subr.bf16.mxu1 %v1451_v25 }
  0x4b   : > { %571 = vmatpush1.bf16.msra.mxu0 %v1432_v22 }
  0x4c   : > { %572 = vmatprep.subr.bf16.mxu0 %v1438_v23  ;;  %612 = vmatpush1.bf16.msra.mxu1 %v1469_v28 }
  0x4d   : > { %613 = vmatprep.subr.bf16.mxu1 %v1475_v29 }
  0x4f   : > { %573 = vmatpush1.bf16.msra.mxu0 %v1457_v26 }
  0x50   : > { %574 = vmatprep.subr.bf16.mxu0 %v1463_v27  ;;  %614 = vmatpush1.bf16.msra.mxu1 %v1490_v32 }
  0x51   : > { %615 = vmatprep.subr.bf16.mxu1 %v1496_v33 }
  0x53   : > { %575 = vmatpush1.bf16.msra.mxu0 %v1481_v30 }
  0x54   : > { %687 = vmatprep.subr.bf16.mxu0 %v1314_v1  ;;  %616 = vmatpush1.bf16.msra.mxu1 %v1505_v35 }
  0x55   : > { %728 = vmatprep.subr.bf16.mxu1 %v1344_v7 }
  0xf6   : > { %v467_v37 = vpop.f32.mrf.mxu0  ;;  %v508_v45 = vpop.f32.mrf.mxu1 }
  0xf7   : > { %v515_v39 = vadd.f32 %v467_v37, %v268_v36  ;;  %v517_v50 = vadd.f32 %v508_v45, %v270_v48  ;;  %v548_v36 = vstv %s546_s30 }
  0xf8   : > { %v469_v40 = vpop.f32.mrf.mxu0  ;;  %v510_v47 = vpop.f32.mrf.mxu1 }
  0xf9   : > { %v1021_v41 = vmul.f32 -1.442695, %v515_v39  ;;  %v516_v42 = vadd.f32 %v469_v40, %v269_v38  ;;  %v1023_v53 = vmul.f32 -1.442695, %v517_v50  ;;  %v518_v54 = vadd.f32 %v510_v47, %v271_v52 }
  0xfa   : > { %v471_v43 = vpop.f32.mrf.mxu0  ;;  %v512_v49 = vpop.f32.mrf.mxu1 }
  0xfb   : > { %1173 = vpow2.f32 %v1021_v41  ;;  %v1022_v44 = vmul.f32 -1.442695, %v516_v42 }
  0xfc   : > { %v472_v46 = vpop.f32.mrf.mxu0  ;;  %v513_v51 = vpop.f32.mrf.mxu1 }
  0xfd   : > { %1175 = vpow2.f32 %v1022_v44  ;;  %v675_v46 = vstv %s673_s7 }
  0xfe   : > { %1177 = vpow2.f32 %v1023_v53 }
  0xff   : > { %1179 = vtanh.f32 %v518_v54 }
 0x108   : > { %v1174_v55 = vpop.eup %1173 }
 0x109   : > { %v528_v56 = vadd.f32 1.0, %v1174_v55 }
 0x10a   : > { %v1176_v57 = vpop.eup %1175 }
 0x10b   : > { %1181 = vrcp.f32 %v528_v56  ;;  %v529_v58 = vadd.f32 1.0, %v1176_v57  ;;  %v1178_v59 = vpop.eup %1177  ;;  %v1031_v57 = vld [vmem:[%s1308_s24 + $0x40] sm:$0xff] }
 0x10c   : > { %v1180_v60 = vpop.eup %1179  ;;  %v530_v0 = vadd.f32 1.0, %v1178_v59 }
 0x10d   : > { %1183 = vrcp.f32 %v529_v58 }
 0x10e   : > { %1185 = vrcp.f32 %v530_v0 }
 0x118   : > { %v1182_v61 = vpop.eup %1181 }
 0x119   : > { %v539_v7 = vmul.f32 %v1182_v61, %v1180_v60  ;;  %v1032_v60 = vld [vmem:[%s1308_s24 + $0x48] sm:$0xff] }
 0x11a   : > { %v1184_v63 = vpop.eup %1183 }
 0x11b   : > { %v538_v1 = vmul.f32 %v1184_v63, %v1551_v62  ;;  %v1186_v39 = vpop.eup %1185 }
 0x11d   : > { %v540_v34 = vadd.f32 %v539_v7, %v538_v1 }
 0x11f   : > { %1187 = vtanh.f32 %v540_v34  ;;  %v551_v37 = vsub.f32 %v540_v34, %v1551_v62 }
 0x121   : > { %v1555_v38 = vmul.f32 %v551_v37, %v548_v36 }
 0x12c   : > { %v1188_v40 = vpop.eup %1187 }
 0x12d   : > { %v542_v41 = vmul.f32 %v1188_v40, %v1186_v39  ;;  %v1033_v39 = vld [vmem:[%s1308_s24 + $0x50] sm:$0xff] }
 0x12f   : > { %v547_v42 = vsub.f32 %v542_v41, %v1483_v31  ;;  %v1034_v41 = vld [vmem:[%s1308_s24 + $0x58] sm:$0xff] }
 0x131   : > { %v549_v43 = vmul.f32 %v548_v36, %v547_v42 }
 0x133   : > { %v1559_v44 = vadd.f32 %v549_v43, %v1483_v31 }
 0x135   : > { %v559_v45 = vpack.c.bf16 %v1559_v44, %v1559_v44 }
 0x137   : > { %593 = vmatmul.mubr.bf16.vlgmr.msra.gmra.mxu0 %v559_v45  ;;  %634 = vmatmul.mubr.bf16.vlgmr.msra.gmra.mxu1 %v559_v45 }
 0x138   : > { %688 = vmatpush1.bf16.msra.mxu0 %v1319_v2  ;;  %729 = vmatpush1.bf16.msra.mxu1 %v1349_v8  ;;  %v1024_v2 = vld [vmem:[%s1308_s24 + $0x20] sm:$0xff] }
 0x139   : > { %689 = vmatprep.subr.bf16.mxu0 %v1327_v4  ;;  %730 = vmatprep.subr.bf16.mxu1 %v1368_v11 }
 0x13a   : > { %719 = vmatprep.mubr.bf16.mxu0 %v1250_v3  ;;  %760 = vmatprep.mubr.bf16.mxu1 %v1250_v3 }
 0x13c   : > { %690 = vmatpush1.bf16.msra.mxu0 %v1333_v5  ;;  %731 = vmatpush1.bf16.msra.mxu1 %v1373_v12  ;;  %v1025_v5 = vld [vmem:[%s1308_s24 + $0x28] sm:$0xff] }
 0x13d   : > { %691 = vmatprep.subr.bf16.mxu0 %v1339_v6  ;;  %732 = vmatprep.subr.bf16.mxu1 %v1390_v15 }
 0x140   : > { %692 = vmatpush1.bf16.msra.mxu0 %v1355_v9  ;;  %733 = vmatpush1.bf16.msra.mxu1 %v1397_v16 }
 0x141   : > { %693 = vmatprep.subr.bf16.mxu0 %v1362_v10  ;;  %734 = vmatprep.subr.bf16.mxu1 %v1403_v17  ;;  %v1026_v17 = vld [vmem:[%s1308_s24 + $0x30] sm:$0xff] }
 0x144   : > { %694 = vmatpush1.bf16.msra.mxu0 %v1380_v13  ;;  %735 = vmatpush1.bf16.msra.mxu1 %v1421_v20 }
 0x145   : > { %695 = vmatprep.subr.bf16.mxu0 %v1385_v14  ;;  %736 = vmatprep.subr.bf16.mxu1 %v1427_v21 }
 0x148   : > { %696 = vmatpush1.bf16.msra.mxu0 %v1409_v18  ;;  %737 = vmatpush1.bf16.msra.mxu1 %v1445_v24 }
 0x149   : > { %697 = vmatprep.subr.bf16.mxu0 %v1415_v19  ;;  %738 = vmatprep.subr.bf16.mxu1 %v1451_v25  ;;  %v1027_v19 = vld [vmem:[%s1308_s24 + $0x38] sm:$0xff] }
 0x14c   : > { %698 = vmatpush1.bf16.msra.mxu0 %v1432_v22  ;;  %739 = vmatpush1.bf16.msra.mxu1 %v1469_v28 }
 0x14d   : > { %699 = vmatprep.subr.bf16.mxu0 %v1438_v23  ;;  %740 = vmatprep.subr.bf16.mxu1 %v1475_v29  ;;  %v553_v29 = vadd.f32 %v1555_v38, %v1551_v62 }
 0x150   : > { %700 = vmatpush1.bf16.msra.mxu0 %v1457_v26  ;;  %741 = vmatpush1.bf16.msra.mxu1 %v1490_v32 }
 0x151   : > { %701 = vmatprep.subr.bf16.mxu0 %v1463_v27  ;;  %742 = vmatprep.subr.bf16.mxu1 %v1496_v33 }
 0x154   : > { %702 = vmatpush1.bf16.msra.mxu0 %v1481_v30  ;;  %743 = vmatpush1.bf16.msra.mxu1 %v1505_v35 }
 0x1f7   : > { %v594_v3 = vpop.f32.mrf.mxu0  ;;  %v635_v4 = vpop.f32.mrf.mxu1 }
 0x1f8   : > { %v642_v6 = vadd.f32 %v1024_v2, %v594_v3  ;;  %v644_v18 = vadd.f32 %v1026_v17, %v635_v4 }
 0x1f9   : > { %v596_v8 = vpop.f32.mrf.mxu0  ;;  %v637_v9 = vpop.f32.mrf.mxu1 }
 0x1fa   : > { %v1028_v10 = vmul.f32 -1.442695, %v642_v6  ;;  %v643_v11 = vadd.f32 %v1025_v5, %v596_v8  ;;  %v1030_v20 = vmul.f32 -1.442695, %v644_v18  ;;  %v645_v22 = vadd.f32 %v1027_v19, %v637_v9 }
 0x1fb   : > { %v598_v12 = vpop.f32.mrf.mxu0  ;;  %v639_v13 = vpop.f32.mrf.mxu1 }
 0x1fc   : > { %1189 = vpow2.f32 %v1028_v10  ;;  %v1029_v14 = vmul.f32 -1.442695, %v643_v11  ;;  %v802_v13 = vstv %s800_s10 }
 0x1fd   : > { %v599_v15 = vpop.f32.mrf.mxu0  ;;  %v640_v16 = vpop.f32.mrf.mxu1 }
 0x1fe   : > { %1191 = vpow2.f32 %v1029_v14 }
 0x1ff   : > { %1193 = vpow2.f32 %v1030_v20 }
 0x209   : > { %v1190_v21 = vpop.eup %1189 }
 0x20a   : > { %v655_v23 = vadd.f32 1.0, %v1190_v21 }
 0x20b   : > { %v1192_v24 = vpop.eup %1191 }
 0x20c   : > { %1195 = vrcp.f32 %v655_v23  ;;  %v656_v25 = vadd.f32 1.0, %v1192_v24  ;;  %v1194_v26 = vpop.eup %1193 }
 0x20d   : > { %1197 = vtanh.f32 %v645_v22  ;;  %v657_v31 = vadd.f32 1.0, %v1194_v26 }
 0x20e   : > { %1199 = vrcp.f32 %v656_v25 }
 0x20f   : > { %1201 = vrcp.f32 %v657_v31 }
 0x219   : > { %v1196_v27 = vpop.eup %1195 }
 0x21a   : > { %v1198_v28 = vpop.eup %1197 }
 0x21b   : > { %v1200_v30 = vpop.eup %1199  ;;  %v666_v33 = vmul.f32 %v1198_v28, %v1196_v27 }
 0x21c   : > { %v665_v32 = vmul.f32 %v1200_v30, %v553_v29  ;;  %v1202_v50 = vpop.eup %1201 }
 0x21e   : > { %v667_v35 = vadd.f32 %v666_v33, %v665_v32 }
 0x220   : > { %1203 = vtanh.f32 %v667_v35  ;;  %v678_v47 = vsub.f32 %v667_v35, %v553_v29 }
 0x222   : > { %v679_v48 = vmul.f32 %v678_v47, %v675_v46 }
 0x224   : > { %v680_v49 = vadd.f32 %v679_v48, %v553_v29 }
 0x22d   : > { %v1204_v51 = vpop.eup %1203 }
 0x22e   : > { %v669_v52 = vmul.f32 %v1204_v51, %v1202_v50 }
 0x230   : > { %v674_v53 = vsub.f32 %v669_v52, %v1559_v44 }
 0x232   : > { %v676_v54 = vmul.f32 %v675_v46, %v674_v53 }
 0x234   : > { %v677_v55 = vadd.f32 %v676_v54, %v1559_v44 }
 0x236   : > { %v686_v56 = vpack.c.bf16 %v677_v55, %v677_v55 }
 0x238   : > { %720 = vmatmul.mubr.bf16.vlgmr.msra.gmra.mxu0 %v686_v56  ;;  %761 = vmatmul.mubr.bf16.vlgmr.msra.gmra.mxu1 %v686_v56 }
 0x2f8   : > { %v721_v58 = vpop.f32.mrf.mxu0  ;;  %v762_v59 = vpop.f32.mrf.mxu1 }
 0x2f9   : > { %v769_v61 = vadd.f32 %v1031_v57, %v721_v58  ;;  %v771_v40 = vadd.f32 %v1033_v39, %v762_v59 }
 0x2fa   : > { %v723_v62 = vpop.f32.mrf.mxu0  ;;  %v764_v63 = vpop.f32.mrf.mxu1 }
 0x2fb   : > { %v1035_v0 = vmul.f32 -1.442695, %v769_v61  ;;  %v770_v1 = vadd.f32 %v1032_v60, %v723_v62  ;;  %v1037_v42 = vmul.f32 -1.442695, %v771_v40  ;;  %v772_v44 = vadd.f32 %v1034_v41, %v764_v63 }
 0x2fc   : > { %v725_v7 = vpop.f32.mrf.mxu0  ;;  %v766_v34 = vpop.f32.mrf.mxu1 }
 0x2fd   : > { %1205 = vpow2.f32 %v1035_v0  ;;  %v1036_v36 = vmul.f32 -1.442695, %v770_v1 }
 0x2fe   : > { %v726_v37 = vpop.f32.mrf.mxu0  ;;  %v767_v38 = vpop.f32.mrf.mxu1 }
 0x2ff   : > { %1207 = vpow2.f32 %v1036_v36 }
 0x300   : > { %1209 = vpow2.f32 %v1037_v42 }
 0x30a   : > { %v1206_v43 = vpop.eup %1205 }
 0x30b   : > { %v782_v45 = vadd.f32 1.0, %v1206_v43 }
 0x30c   : > { %v1208_v2 = vpop.eup %1207 }
 0x30d   : > { %1211 = vrcp.f32 %v782_v45  ;;  %v783_v3 = vadd.f32 1.0, %v1208_v2  ;;  %v1210_v4 = vpop.eup %1209 }
 0x30e   : > { %1213 = vtanh.f32 %v772_v44  ;;  %v784_v9 = vadd.f32 1.0, %v1210_v4 }
 0x30f   : > { %1215 = vrcp.f32 %v783_v3 }
 0x310   : > { %1217 = vrcp.f32 %v784_v9 }
 0x31a   : > { %v1212_v5 = vpop.eup %1211 }
 0x31b   : > { %v1214_v6 = vpop.eup %1213 }
 0x31c   : > { %v1216_v8 = vpop.eup %1215  ;;  %v793_v11 = vmul.f32 %v1214_v6, %v1212_v5 }
 0x31d   : > { %v792_v10 = vmul.f32 %v1216_v8, %v680_v49  ;;  %v1218_v17 = vpop.eup %1217 }
 0x31f   : > { %v794_v12 = vadd.f32 %v793_v11, %v792_v10 }
 0x321   : > { %1219 = vtanh.f32 %v794_v12  ;;  %v805_v14 = vsub.f32 %v794_v12, %v680_v49 }
 0x323   : > { %v806_v15 = vmul.f32 %v805_v14, %v802_v13 }
 0x325   : > { %v807_v16 = vadd.f32 %v806_v15, %v680_v49 }
 0x327   : > { %809 = vst [vmem:[#allocation3] sm:$0xff] %v807_v16 }
 0x32e   : > { %v1220_v18 = vpop.eup %1219 }
 0x32f   : > { %v796_v19 = vmul.f32 %v1220_v18, %v1218_v17 }
 0x331   : > { %v801_v20 = vsub.f32 %v796_v19, %v677_v55 }
 0x333   : > { %v803_v21 = vmul.f32 %v802_v13, %v801_v20  ;;  %813 = sbr.rel (%p1038_p8) target bundleno = 1085 (0x43d), region = 44 }
 0x335   : > { %v804_v22 = vadd.f32 %v803_v21, %v677_v55 }
 0x337   : > { %808 = vst [vmem:[#allocation2] sm:$0xff] %v804_v22 }
 0x338   : > { %v829_v23 = vld [vmem:[%s1675_s2 + $0x78] sm:$0xff]  ;;  %v1251_v24 = vmov 0.0   ;;  %v828_v25 = vld [vmem:[%s1675_s2 + $0x70] sm:$0xff]  ;;  %vm1252_vm0 = vmmov 0   ;;  %v827_v26 = vld [vmem:[%s1675_s2 + $0x68] sm:$0xff] }
 0x339   : > { %1062 = vmatprep.subr.mxu0 %v1251_v24  ;;  %1094 = vmatprep.mubr.msk.f32.mxu0 %vm1252_vm0, %v1251_v24  ;;  %v826_v27 = vld [vmem:[%s1675_s2 + $0x60] sm:$0xff]  ;;  %v825_v28 = vld [vmem:[%s1675_s2 + $0x58] sm:$0xff]  ;;  %v824_v29 = vld [vmem:[%s1675_s2 + $0x50] sm:$0xff] }
 0x33a   : > { %1063 = vmatpush3.msra.mxu0 %v829_v23  ;;  %v823_v30 = vld [vmem:[%s1675_s2 + $0x48] sm:$0xff]  ;;  %v822_v31 = vld [vmem:[%s1675_s2 + $0x40] sm:$0xff]  ;;  %v821_v32 = vld [vmem:[%s1675_s2 + $0x38] sm:$0xff] }
 0x33b   : > { %1064 = vmatprep.subr.mxu0 %v1251_v24  ;;  %v820_v33 = vld [vmem:[%s1675_s2 + $0x30] sm:$0xff]  ;;  %v819_v35 = vld [vmem:[%s1675_s2 + $0x28] sm:$0xff]  ;;  %v818_v46 = vld [vmem:[%s1675_s2 + $0x20] sm:$0xff] }
 0x33c   : > { %1065 = vmatpush3.msra.mxu0 %v828_v25  ;;  %v817_v47 = vld [vmem:[%s1675_s2 + $0x18] sm:$0xff]  ;;  %v816_v48 = vld [vmem:[%s1675_s2 + $0x10] sm:$0xff]  ;;  %v815_v49 = vld [vmem:[%s1675_s2 + $0x8] sm:$0xff] }
 0x33d   : > { %1066 = vmatprep.subr.mxu0 %v1251_v24  ;;  %v814_v50 = vld [vmem:[%s1675_s2] sm:$0xff] }
 0x33e   : > { %1067 = vmatpush3.msra.mxu0 %v827_v26  ;;  %v1039_v51 = vld [vmem:[%s1676_s3] ss:$0 sm:$0xff] }
 0x33f   : > { %1068 = vmatprep.subr.mxu0 %v1251_v24 }
 0x340   : > { %1069 = vmatpush3.msra.mxu0 %v826_v27 }
 0x341   : > { %1070 = vmatprep.subr.mxu0 %v1251_v24 }
 0x342   : > { %1071 = vmatpush3.msra.mxu0 %v825_v28 }
 0x343   : > { %1072 = vmatprep.subr.mxu0 %v1251_v24 }
 0x344   : > { %1073 = vmatpush3.msra.mxu0 %v824_v29 }
 0x345   : > { %1074 = vmatprep.subr.mxu0 %v1251_v24 }
 0x346   : > { %1075 = vmatpush3.msra.mxu0 %v823_v30 }
 0x347   : > { %1076 = vmatprep.subr.mxu0 %v1251_v24 }
 0x348   : > { %1077 = vmatpush3.msra.mxu0 %v822_v31 }
 0x349   : > { %1078 = vmatprep.subr.mxu0 %v1251_v24 }
 0x34a   : > { %1079 = vmatpush3.msra.mxu0 %v821_v32 }
 0x34b   : > { %1080 = vmatprep.subr.mxu0 %v1251_v24 }
 0x34c   : > { %1081 = vmatpush3.msra.mxu0 %v820_v33 }
 0x34d   : > { %1082 = vmatprep.subr.mxu0 %v1251_v24 }
 0x34e   : > { %1083 = vmatpush3.msra.mxu0 %v819_v35 }
 0x34f   : > { %1084 = vmatprep.subr.mxu0 %v1251_v24 }
 0x350   : > { %1085 = vmatpush3.msra.mxu0 %v818_v46 }
 0x351   : > { %1086 = vmatprep.subr.mxu0 %v1251_v24 }
 0x352   : > { %1087 = vmatpush3.msra.mxu0 %v817_v47 }
 0x353   : > { %1088 = vmatprep.subr.mxu0 %v1251_v24 }
 0x354   : > { %1089 = vmatpush3.msra.mxu0 %v816_v48 }
 0x355   : > { %1090 = vmatprep.subr.mxu0 %v1251_v24 }
 0x356   : > { %1091 = vmatpush3.msra.mxu0 %v815_v49 }
 0x357   : > { %1092 = vmatprep.subr.mxu0 %v1251_v24 }
 0x358   : > { %1093 = vmatpush3.msra.mxu0 %v814_v50 }
 0x359   : > { %1095 = vmatmul.mubr.f32.vlgmr.msra.gmra.mxu0 %v804_v22 }
 0x419   : > { %v903_v52 = vpop.f32.mrf.mxu0 }
 0x41a   : > { %v904_v53 = vadd.f32 %v1039_v51, %v903_v52 }
 0x41b   : > { %v1096_v54 = vpop.f32.mrf.mxu0 }
 0x41c   : > { %v1040_v55 = vmul.f32 -1.442695, %v904_v53 }
 0x41e   : > { %1221 = vpow2.f32 %v1040_v55 }
 0x42b   : > { %v1222_v56 = vpop.eup %1221 }
 0x42c   : > { %v910_v57 = vadd.f32 1.0, %v1222_v56 }
 0x42e   : > { %1223 = vrcp.f32 %v910_v57 }
 0x43b   : > { %v1224_v58 = vpop.eup %1223 }
 0x43c   : > { %913 = vst [vmem:[%s1677_s4] sm:$0xff] %v1224_v58 }
 0x43d PF: > { %s14_s17 = sadd.s32 1, %s1247_s17   ;;  %s1678_s15 = smov %s1243_s16 }
 0x43e   : > { %p11_p9 = scmp.ge.s32.totalorder %s14_s17, 5   ;;  %s1679_s16 = smov %s1681_s18 }
 0x440   :  { %13 = sbr.rel (!%p11_p9) target bundleno = 2 (0x2), region = 76 }

</bundles_post_ra>
